<compile_context>
chip_gen: v5e
topology: v5e:2x2
jax: 0.10.0
libtpu: 0.0.40
codegen_flags: <defaults>
</compile_context>

<pallas_src>
import functools

import jax
import jax.numpy as jnp
from jax.experimental import pallas as pl
from jax.experimental.pallas import tpu as pltpu


def _fc_graph_kernel(x_ref,
                     w1_ref, b1_ref, w2_ref, b2_ref, w3_ref, b3_ref,
                     w4_ref, b4_ref, w5_ref, b5_ref, w6_ref, b6_ref,
                     o_ref):
    # NOTE: partial last batch tiles compute on padded/garbage rows; harmless
    # because every op here is purely row-wise (no cross-row reductions) and the
    # out-of-range rows are masked on the store.  Keep it that way.
    def linear(h, w_ref, b_ref):
        # MXU operands in the weights' dtype (bf16 fast path), f32 accumulate;
        # bias add + activation run in f32 on the VPU.
        return jnp.dot(h.astype(w_ref.dtype), w_ref[...],
                       preferred_element_type=jnp.float32) + b_ref[...]

    h = jnp.maximum(linear(x_ref[...], w1_ref, b1_ref), 0.0)   # fc1 + relu
    res = h
    h = jnp.maximum(linear(h, w2_ref, b2_ref), 0.0) + res      # fc2 + relu + residual
    h = jnp.maximum(linear(h, w3_ref, b3_ref), 0.0)            # fc3 + relu
    res = h
    h = jnp.maximum(linear(h, w4_ref, b4_ref), 0.0) + res      # fc4 + relu + residual
    h = jnp.maximum(linear(h, w5_ref, b5_ref), 0.0)            # fc5 + relu
    out = linear(h, w6_ref, b6_ref)                            # fc6 (no activation)

    # Output is lane-sparse (2*outChs of 128 lanes -> masked vst).  Writeback
    # bytes are tiny; only present a lane-dense slab if a profile shows the
    # store slot binding.
    o_ref[...] = out.astype(o_ref.dtype)


def pack_params(params, matmul_dtype=jnp.bfloat16):
    """One-time prep (outside the per-call path): build the row-packed
    block-diagonal weights, already cast to the MXU dtype.  Biases stay f32."""
    packed = {}
    for i in range(1, 7):
        w = params[f"w{i}"]                      # [in, out]
        b = params[f"b{i}"]                      # [1, out]
        fin, fout = w.shape
        w2 = jnp.zeros((2 * fin, 2 * fout), jnp.float32)
        w2 = w2.at[:fin, :fout].set(w).at[fin:, fout:].set(w)
        packed[f"w{i}"] = w2.astype(matmul_dtype)
        packed[f"b{i}"] = jnp.concatenate([b, b], axis=1).astype(jnp.float32)
    return packed


def _ceil_to(n, m):
    return -(-n // m) * m


def _num_tensorcores():
    """Best-effort TensorCores-per-chip (v4/v5p/v7x = 2; v5e/v6e = 1).
    Only steers a tiling heuristic; correctness never depends on it."""
    try:
        kind = jax.devices()[0].device_kind.lower()
    except Exception:
        return 1
    return 2 if any(t in kind for t in ("v7", "v5p", "v4")) else 1


def _pick_block_b(rows, block_b, num_cores):
    """Row-tile size over packed rows: multiple of 8 (sublane) unless it is the
    full extent.  A fits-in-one-tile batch is only split when the chip has two
    TensorCores, and the ('parallel',) grid is kept balanced so neither core
    gets ~2x the work."""
    bb = min(block_b, rows)
    if bb >= rows:
        if num_cores >= 2 and rows >= 16:
            half = _ceil_to(pl.cdiv(rows, 2), 8)
            if half < rows:
                return half
        return rows
    bb = max(8, (bb // 8) * 8)
    if num_cores >= 2:
        steps = pl.cdiv(rows, bb)
        if steps % 2:
            steps += 1
        bb = max(8, min(bb, _ceil_to(pl.cdiv(rows, steps), 8)))
    return bb


@functools.partial(jax.jit, static_argnames=("block_b",))
def fc_model_graph_forward(x, packed_params, *, block_b=2048):
    """x: [B, numFeats] f32.  packed_params: output of pack_params()."""
    B, num_feats = x.shape
    assert packed_params["w1"].shape[0] == 2 * num_feats
    out_chs = packed_params["w6"].shape[1] // 2

    # Pack two batch rows per 128-lane vreg row (free, contiguous reshape).
    B_pad = B + (B % 2)
    if B_pad != B:                                    # odd batch: pad one row
        x = jnp.concatenate([x, jnp.zeros((1, num_feats), x.dtype)], axis=0)
    rows = B_pad // 2
    xp = x.reshape(rows, 2 * num_feats)               # stays f32: cast happens
                                                      # at the dot inside kernel
    bb = _pick_block_b(rows, block_b, _num_tensorcores())
    grid = (pl.cdiv(rows, bb),)

    def full(shape):
        ndim = len(shape)
        # full-array block, same block index for every batch-grid step
        return pl.BlockSpec(shape, lambda i: (0,) * ndim)

    weight_specs, weight_args = [], []
    flops = 0
    weight_bytes = 0
    for k in range(1, 7):
        w = packed_params[f"w{k}"]
        b = packed_params[f"b{k}"]
        weight_specs += [full(w.shape), full(b.shape)]
        weight_args += [w, b]
        flops += 2 * rows * w.shape[0] * w.shape[1]
        weight_bytes += int(w.size) * w.dtype.itemsize + int(b.size) * b.dtype.itemsize

    cost = pl.CostEstimate(
        flops=int(flops),
        transcendentals=0,
        bytes_accessed=int(xp.size * xp.dtype.itemsize
                           + rows * 2 * out_chs * 4 + weight_bytes),
    )

    out_packed = pl.pallas_call(
        _fc_graph_kernel,
        out_shape=jax.ShapeDtypeStruct((rows, 2 * out_chs), jnp.float32),
        grid_spec=pltpu.PrefetchScalarGridSpec(
            num_scalar_prefetch=0,
            grid=grid,
            in_specs=[pl.BlockSpec((bb, 2 * num_feats), lambda i: (i, 0))]
                     + weight_specs,
            out_specs=pl.BlockSpec((bb, 2 * out_chs), lambda i: (i, 0)),
        ),
        compiler_params=pltpu.CompilerParams(
            dimension_semantics=("parallel",)),
        cost_estimate=cost,
    )(xp, *weight_args)

    out = out_packed.reshape(B_pad, out_chs)          # free reshape
    return out[:B] if B_pad != B else out


def init_params(num_feats, out_chs, key):
    """Biases zero (matches _initialize_weights); weights use PyTorch-style
    uniform(-1/sqrt(fan_in), 1/sqrt(fan_in)) Linear init."""
    dims = [(num_feats, 64), (64, 64), (64, 64), (64, 64), (64, 32), (32, out_chs)]
    params = {}
    keys = jax.random.split(key, len(dims))
    for i, ((fan_in, fan_out), k) in enumerate(zip(dims, keys), start=1):
        bound = 1.0 / jnp.sqrt(fan_in)
        params[f"w{i}"] = jax.random.uniform(
            k, (fan_in, fan_out), jnp.float32, minval=-bound, maxval=bound)
        params[f"b{i}"] = jnp.zeros((1, fan_out), jnp.float32)
    return params


def reference_forward(x, params):
    def lin(h, i):
        return h @ params[f"w{i}"] + params[f"b{i}"]
    h = jax.nn.relu(lin(x, 1))
    h = jax.nn.relu(lin(h, 2)) + h
    h = jax.nn.relu(lin(h, 3))
    h = jax.nn.relu(lin(h, 4)) + h
    h = jax.nn.relu(lin(h, 5))
    return lin(h, 6)


if __name__ == "__main__":
    num_feats, out_chs = 32, 8
    key = jax.random.PRNGKey(0)
    kp, kx1, kx2, kx3 = jax.random.split(key, 4)
    params = init_params(num_feats, out_chs, kp)

    # One-time weight prep (block-diagonal packing + dtype cast).
    packed_bf16 = pack_params(params, jnp.bfloat16)
    packed_f32 = pack_params(params, jnp.float32)

    # 1) Small batch, single grid step, bf16 MXU path.
    x1 = jax.random.normal(kx1, (8, num_feats), jnp.float32)
    out1 = fc_model_graph_forward(x1, packed_bf16)
    jax.block_until_ready(out1)
    ref1 = reference_forward(x1, params)
    assert out1.shape == (8, out_chs)
    assert jnp.allclose(out1, ref1, atol=5e-2, rtol=5e-2), \
        float(jnp.max(jnp.abs(out1 - ref1)))

    # 2) Multi-step grid with a partial last tile (12 packed rows -> 8 + 4).
    x2 = jax.random.normal(kx2, (24, num_feats), jnp.float32)
    out2 = fc_model_graph_forward(x2, packed_bf16, block_b=8)
    jax.block_until_ready(out2)
    ref2 = reference_forward(x2, params)
    assert out2.shape == (24, out_chs)
    assert jnp.allclose(out2, ref2, atol=5e-2, rtol=5e-2), \
        float(jnp.max(jnp.abs(out2 - ref2)))

    # 3) Odd batch (exercises the pad-one-row path), bf16.
    x3 = jax.random.normal(kx3, (7, num_feats), jnp.float32)
    out3 = fc_model_graph_forward(x3, packed_bf16)
    jax.block_until_ready(out3)
    ref3 = reference_forward(x3, params)
    assert out3.shape == (7, out_chs)
    assert jnp.allclose(out3, ref3, atol=5e-2, rtol=5e-2), \
        float(jnp.max(jnp.abs(out3 - ref3)))

    # 4) Exact f32 MXU path (tight tolerance).
    out4 = fc_model_graph_forward(x2, packed_f32)
    jax.block_until_ready(out4)
    assert jnp.allclose(out4, ref2, atol=1e-5, rtol=1e-5), \
        float(jnp.max(jnp.abs(out4 - ref2)))

    print("KERNEL_OK")
</pallas_src>

<mosaic_0001>
module attributes {stable_mosaic.version = 11 : i64} {
  func.func @_fc_graph_kernel(%arg0: i32, %arg1: memref<4x64xf32, #tpu.memory_space<vmem>>, %arg2: memref<64x128xbf16, #tpu.memory_space<vmem>>, %arg3: memref<1x128xf32, #tpu.memory_space<vmem>>, %arg4: memref<128x128xbf16, #tpu.memory_space<vmem>>, %arg5: memref<1x128xf32, #tpu.memory_space<vmem>>, %arg6: memref<128x128xbf16, #tpu.memory_space<vmem>>, %arg7: memref<1x128xf32, #tpu.memory_space<vmem>>, %arg8: memref<128x128xbf16, #tpu.memory_space<vmem>>, %arg9: memref<1x128xf32, #tpu.memory_space<vmem>>, %arg10: memref<128x64xbf16, #tpu.memory_space<vmem>>, %arg11: memref<1x64xf32, #tpu.memory_space<vmem>>, %arg12: memref<64x16xbf16, #tpu.memory_space<vmem>>, %arg13: memref<1x16xf32, #tpu.memory_space<vmem>>, %arg14: memref<4x16xf32, #tpu.memory_space<vmem>>) attributes {dimension_semantics = [#tpu.dimension_semantics<parallel>], iteration_bounds = array<i64: 1>, scalar_prefetch = 0 : i64, scratch_operands = 0 : i64, tpu.core_type = #tpu.core_type<tc>, window_params = [{transform_indices = @transform_0, window_bounds = array<i64: 4, 64>}, {pipeline_mode = #tpu.pipeline_mode<synchronous>, transform_indices = @transform_1, window_bounds = array<i64: 64, 128>}, {pipeline_mode = #tpu.pipeline_mode<synchronous>, transform_indices = @transform_2, window_bounds = array<i64: 1, 128>}, {pipeline_mode = #tpu.pipeline_mode<synchronous>, transform_indices = @transform_3, window_bounds = array<i64: 128, 128>}, {pipeline_mode = #tpu.pipeline_mode<synchronous>, transform_indices = @transform_4, window_bounds = array<i64: 1, 128>}, {pipeline_mode = #tpu.pipeline_mode<synchronous>, transform_indices = @transform_5, window_bounds = array<i64: 128, 128>}, {pipeline_mode = #tpu.pipeline_mode<synchronous>, transform_indices = @transform_6, window_bounds = array<i64: 1, 128>}, {pipeline_mode = #tpu.pipeline_mode<synchronous>, transform_indices = @transform_7, window_bounds = array<i64: 128, 128>}, {pipeline_mode = #tpu.pipeline_mode<synchronous>, transform_indices = @transform_8, window_bounds = array<i64: 1, 128>}, {pipeline_mode = #tpu.pipeline_mode<synchronous>, transform_indices = @transform_9, window_bounds = array<i64: 128, 64>}, {pipeline_mode = #tpu.pipeline_mode<synchronous>, transform_indices = @transform_10, window_bounds = array<i64: 1, 64>}, {pipeline_mode = #tpu.pipeline_mode<synchronous>, transform_indices = @transform_11, window_bounds = array<i64: 64, 16>}, {pipeline_mode = #tpu.pipeline_mode<synchronous>, transform_indices = @transform_12, window_bounds = array<i64: 1, 16>}, {transform_indices = @transform_13, window_bounds = array<i64: 4, 16>}]} {
    %c0 = arith.constant 0 : index
    %c0_0 = arith.constant 0 : index
    %0 = vector.load %arg1[%c0, %c0_0] : memref<4x64xf32, #tpu.memory_space<vmem>>, vector<4x64xf32>
    %1 = arith.truncf %0 : vector<4x64xf32> to vector<4x64xbf16>
    %c0_1 = arith.constant 0 : index
    %c0_2 = arith.constant 0 : index
    %2 = vector.load %arg2[%c0_1, %c0_2] : memref<64x128xbf16, #tpu.memory_space<vmem>>, vector<64x128xbf16>
    %cst = arith.constant dense<0.000000e+00> : vector<4x128xf32>
    %3 = tpu.matmul %1, %2, %cst {dimension_numbers = #tpu.dot_dimension_numbers<[1], [0], [0], [1], [0, 0, 1, 1], [], []>} : vector<4x64xbf16>, vector<64x128xbf16>, vector<4x128xf32> -> vector<4x128xf32>
    %c0_3 = arith.constant 0 : index
    %c0_4 = arith.constant 0 : index
    %4 = vector.load %arg3[%c0_3, %c0_4] : memref<1x128xf32, #tpu.memory_space<vmem>>, vector<1x128xf32>
    %5 = vector.broadcast %4 : vector<1x128xf32> to vector<4x128xf32>
    %6 = arith.addf %3, %5 : vector<4x128xf32>
    %cst_5 = arith.constant 0.000000e+00 : f32
    %7 = vector.broadcast %cst_5 : f32 to vector<4x128xf32>
    %8 = arith.maximumf %6, %7 : vector<4x128xf32>
    %9 = arith.truncf %8 : vector<4x128xf32> to vector<4x128xbf16>
    %c0_6 = arith.constant 0 : index
    %c0_7 = arith.constant 0 : index
    %10 = vector.load %arg4[%c0_6, %c0_7] : memref<128x128xbf16, #tpu.memory_space<vmem>>, vector<128x128xbf16>
    %cst_8 = arith.constant dense<0.000000e+00> : vector<4x128xf32>
    %11 = tpu.matmul %9, %10, %cst_8 {dimension_numbers = #tpu.dot_dimension_numbers<[1], [0], [0], [1], [0, 0, 1, 1], [], []>} : vector<4x128xbf16>, vector<128x128xbf16>, vector<4x128xf32> -> vector<4x128xf32>
    %c0_9 = arith.constant 0 : index
    %c0_10 = arith.constant 0 : index
    %12 = vector.load %arg5[%c0_9, %c0_10] : memref<1x128xf32, #tpu.memory_space<vmem>>, vector<1x128xf32>
    %13 = vector.broadcast %12 : vector<1x128xf32> to vector<4x128xf32>
    %14 = arith.addf %11, %13 : vector<4x128xf32>
    %cst_11 = arith.constant 0.000000e+00 : f32
    %15 = vector.broadcast %cst_11 : f32 to vector<4x128xf32>
    %16 = arith.maximumf %14, %15 : vector<4x128xf32>
    %17 = arith.addf %16, %8 : vector<4x128xf32>
    %18 = arith.truncf %17 : vector<4x128xf32> to vector<4x128xbf16>
    %c0_12 = arith.constant 0 : index
    %c0_13 = arith.constant 0 : index
    %19 = vector.load %arg6[%c0_12, %c0_13] : memref<128x128xbf16, #tpu.memory_space<vmem>>, vector<128x128xbf16>
    %cst_14 = arith.constant dense<0.000000e+00> : vector<4x128xf32>
    %20 = tpu.matmul %18, %19, %cst_14 {dimension_numbers = #tpu.dot_dimension_numbers<[1], [0], [0], [1], [0, 0, 1, 1], [], []>} : vector<4x128xbf16>, vector<128x128xbf16>, vector<4x128xf32> -> vector<4x128xf32>
    %c0_15 = arith.constant 0 : index
    %c0_16 = arith.constant 0 : index
    %21 = vector.load %arg7[%c0_15, %c0_16] : memref<1x128xf32, #tpu.memory_space<vmem>>, vector<1x128xf32>
    %22 = vector.broadcast %21 : vector<1x128xf32> to vector<4x128xf32>
    %23 = arith.addf %20, %22 : vector<4x128xf32>
    %cst_17 = arith.constant 0.000000e+00 : f32
    %24 = vector.broadcast %cst_17 : f32 to vector<4x128xf32>
    %25 = arith.maximumf %23, %24 : vector<4x128xf32>
    %26 = arith.truncf %25 : vector<4x128xf32> to vector<4x128xbf16>
    %c0_18 = arith.constant 0 : index
    %c0_19 = arith.constant 0 : index
    %27 = vector.load %arg8[%c0_18, %c0_19] : memref<128x128xbf16, #tpu.memory_space<vmem>>, vector<128x128xbf16>
    %cst_20 = arith.constant dense<0.000000e+00> : vector<4x128xf32>
    %28 = tpu.matmul %26, %27, %cst_20 {dimension_numbers = #tpu.dot_dimension_numbers<[1], [0], [0], [1], [0, 0, 1, 1], [], []>} : vector<4x128xbf16>, vector<128x128xbf16>, vector<4x128xf32> -> vector<4x128xf32>
    %c0_21 = arith.constant 0 : index
    %c0_22 = arith.constant 0 : index
    %29 = vector.load %arg9[%c0_21, %c0_22] : memref<1x128xf32, #tpu.memory_space<vmem>>, vector<1x128xf32>
    %30 = vector.broadcast %29 : vector<1x128xf32> to vector<4x128xf32>
    %31 = arith.addf %28, %30 : vector<4x128xf32>
    %cst_23 = arith.constant 0.000000e+00 : f32
    %32 = vector.broadcast %cst_23 : f32 to vector<4x128xf32>
    %33 = arith.maximumf %31, %32 : vector<4x128xf32>
    %34 = arith.addf %33, %25 : vector<4x128xf32>
    %35 = arith.truncf %34 : vector<4x128xf32> to vector<4x128xbf16>
    %c0_24 = arith.constant 0 : index
    %c0_25 = arith.constant 0 : index
    %36 = vector.load %arg10[%c0_24, %c0_25] : memref<128x64xbf16, #tpu.memory_space<vmem>>, vector<128x64xbf16>
    %cst_26 = arith.constant dense<0.000000e+00> : vector<4x64xf32>
    %37 = tpu.matmul %35, %36, %cst_26 {dimension_numbers = #tpu.dot_dimension_numbers<[1], [0], [0], [1], [0, 0, 1, 1], [], []>} : vector<4x128xbf16>, vector<128x64xbf16>, vector<4x64xf32> -> vector<4x64xf32>
    %c0_27 = arith.constant 0 : index
    %c0_28 = arith.constant 0 : index
    %38 = vector.load %arg11[%c0_27, %c0_28] : memref<1x64xf32, #tpu.memory_space<vmem>>, vector<1x64xf32>
    %39 = vector.broadcast %38 : vector<1x64xf32> to vector<4x64xf32>
    %40 = arith.addf %37, %39 : vector<4x64xf32>
    %cst_29 = arith.constant 0.000000e+00 : f32
    %41 = vector.broadcast %cst_29 : f32 to vector<4x64xf32>
    %42 = arith.maximumf %40, %41 : vector<4x64xf32>
    %43 = arith.truncf %42 : vector<4x64xf32> to vector<4x64xbf16>
    %c0_30 = arith.constant 0 : index
    %c0_31 = arith.constant 0 : index
    %44 = vector.load %arg12[%c0_30, %c0_31] : memref<64x16xbf16, #tpu.memory_space<vmem>>, vector<64x16xbf16>
    %cst_32 = arith.constant dense<0.000000e+00> : vector<4x16xf32>
    %45 = tpu.matmul %43, %44, %cst_32 {dimension_numbers = #tpu.dot_dimension_numbers<[1], [0], [0], [1], [0, 0, 1, 1], [], []>} : vector<4x64xbf16>, vector<64x16xbf16>, vector<4x16xf32> -> vector<4x16xf32>
    %c0_33 = arith.constant 0 : index
    %c0_34 = arith.constant 0 : index
    %46 = vector.load %arg13[%c0_33, %c0_34] : memref<1x16xf32, #tpu.memory_space<vmem>>, vector<1x16xf32>
    %47 = vector.broadcast %46 : vector<1x16xf32> to vector<4x16xf32>
    %48 = arith.addf %45, %47 : vector<4x16xf32>
    %c0_35 = arith.constant 0 : index
    %c0_36 = arith.constant 0 : index
    %49 = vector.load %arg14[%c0_35, %c0_36] : memref<4x16xf32, #tpu.memory_space<vmem>>, vector<4x16xf32>
    tpu.vector_store %arg14[%c0_35, %c0_36], %48 {strides = array<i32>} : memref<4x16xf32, #tpu.memory_space<vmem>>, vector<4x16xf32>,
    return
  }
  func.func @transform_0(%arg0: i32) -> (i32, i32) {
    %c0_i32 = arith.constant 0 : i32
    %c0_i32_0 = arith.constant 0 : i32
    return %arg0, %c0_i32 : i32, i32
  }
  func.func @transform_1(%arg0: i32) -> (i32, i32) {
    %c0_i32 = arith.constant 0 : i32
    %c0_i32_0 = arith.constant 0 : i32
    %c0_i32_1 = arith.constant 0 : i32
    return %c0_i32, %c0_i32_0 : i32, i32
  }
  func.func @transform_2(%arg0: i32) -> (i32, i32) {
    %c0_i32 = arith.constant 0 : i32
    %c0_i32_0 = arith.constant 0 : i32
    %c0_i32_1 = arith.constant 0 : i32
    return %c0_i32, %c0_i32_0 : i32, i32
  }
  func.func @transform_3(%arg0: i32) -> (i32, i32) {
    %c0_i32 = arith.constant 0 : i32
    %c0_i32_0 = arith.constant 0 : i32
    %c0_i32_1 = arith.constant 0 : i32
    return %c0_i32, %c0_i32_0 : i32, i32
  }
  func.func @transform_4(%arg0: i32) -> (i32, i32) {
    %c0_i32 = arith.constant 0 : i32
    %c0_i32_0 = arith.constant 0 : i32
    %c0_i32_1 = arith.constant 0 : i32
    return %c0_i32, %c0_i32_0 : i32, i32
  }
  func.func @transform_5(%arg0: i32) -> (i32, i32) {
    %c0_i32 = arith.constant 0 : i32
    %c0_i32_0 = arith.constant 0 : i32
    %c0_i32_1 = arith.constant 0 : i32
    return %c0_i32, %c0_i32_0 : i32, i32
  }
  func.func @transform_6(%arg0: i32) -> (i32, i32) {
    %c0_i32 = arith.constant 0 : i32
    %c0_i32_0 = arith.constant 0 : i32
    %c0_i32_1 = arith.constant 0 : i32
    return %c0_i32, %c0_i32_0 : i32, i32
  }
  func.func @transform_7(%arg0: i32) -> (i32, i32) {
    %c0_i32 = arith.constant 0 : i32
    %c0_i32_0 = arith.constant 0 : i32
    %c0_i32_1 = arith.constant 0 : i32
    return %c0_i32, %c0_i32_0 : i32, i32
  }
  func.func @transform_8(%arg0: i32) -> (i32, i32) {
    %c0_i32 = arith.constant 0 : i32
    %c0_i32_0 = arith.constant 0 : i32
    %c0_i32_1 = arith.constant 0 : i32
    return %c0_i32, %c0_i32_0 : i32, i32
  }
  func.func @transform_9(%arg0: i32) -> (i32, i32) {
    %c0_i32 = arith.constant 0 : i32
    %c0_i32_0 = arith.constant 0 : i32
    %c0_i32_1 = arith.constant 0 : i32
    return %c0_i32, %c0_i32_0 : i32, i32
  }
  func.func @transform_10(%arg0: i32) -> (i32, i32) {
    %c0_i32 = arith.constant 0 : i32
    %c0_i32_0 = arith.constant 0 : i32
    %c0_i32_1 = arith.constant 0 : i32
    return %c0_i32, %c0_i32_0 : i32, i32
  }
  func.func @transform_11(%arg0: i32) -> (i32, i32) {
    %c0_i32 = arith.constant 0 : i32
    %c0_i32_0 = arith.constant 0 : i32
    %c0_i32_1 = arith.constant 0 : i32
    return %c0_i32, %c0_i32_0 : i32, i32
  }
  func.func @transform_12(%arg0: i32) -> (i32, i32) {
    %c0_i32 = arith.constant 0 : i32
    %c0_i32_0 = arith.constant 0 : i32
    %c0_i32_1 = arith.constant 0 : i32
    return %c0_i32, %c0_i32_0 : i32, i32
  }
  func.func @transform_13(%arg0: i32) -> (i32, i32) {
    %c0_i32 = arith.constant 0 : i32
    %c0_i32_0 = arith.constant 0 : i32
    return %arg0, %c0_i32 : i32, i32
  }
}

</mosaic_0001>

<bundles_post_ra>
// kernel: fc_model_graph_forward.1
= control target key start
LH: loop header
LB: loop body
LE: loop exit
PB: predicated region body
PF: predicated region fallthrough
CT: control target
= control target key end

     0   :  { %18 = vsyncpa [#allocation3], 0  ;;  %s982_s0 = inlined_call_operand.vmem [shape: f32[4,64], index: 0, kind: input, shape index: {}]   ;;  %s983_s1 = inlined_call_operand.hbm [shape: bf16[64,128], index: 1, kind: input, shape index: {}]   ;;  %s984_s2 = inlined_call_operand.vmem [shape: f32[1,128], index: 2, kind: input, shape index: {}]   ;;  %s985_s3 = inlined_call_operand.vmem [shape: bf16[128,128], index: 3, kind: input, shape index: {}]   ;;  %s986_s4 = inlined_call_operand.vmem [shape: f32[1,128], index: 4, kind: input, shape index: {}]   ;;  %s987_s5 = inlined_call_operand.vmem [shape: bf16[128,128], index: 5, kind: input, shape index: {}]   ;;  %s988_s6 = inlined_call_operand.vmem [shape: f32[1,128], index: 6, kind: input, shape index: {}]   ;;  %s989_s7 = inlined_call_operand.hbm [shape: bf16[128,128], index: 7, kind: input, shape index: {}]   ;;  %s990_s8 = inlined_call_operand.vmem [shape: f32[1,128], index: 8, kind: input, shape index: {}]   ;;  %s991_s9 = inlined_call_operand.vmem [shape: bf16[128,64], index: 9, kind: input, shape index: {}]   ;;  %s992_s10 = inlined_call_operand.vmem [shape: f32[1,64], index: 10, kind: input, shape index: {}]   ;;  %s993_s11 = inlined_call_operand.vmem [shape: bf16[64,16], index: 11, kind: input, shape index: {}]   ;;  %s994_s12 = inlined_call_operand.vmem [shape: f32[1,16], index: 12, kind: input, shape index: {}]   ;;  %s995_s13 = inlined_call_operand.vmem [shape: f32[4,16], index: 13, kind: output, shape index: {}]  }
   0x1   :  { %s26_s27 = sshll.u32 %s983_s1, 4  ;;  %s27_s27 = int_to_ptr.hbm [resolvable:$true] %s26_s27 }
   0x2   :  { %19 = vsyncpa [#allocation5], 0  ;;  %s792_s28 = smov [#allocation2]   ;;  %s49_s15 = sshll.u32 %s989_s7, 4  ;;  %s50_s15 = int_to_ptr.hbm [resolvable:$true] %s49_s15 }
   0x3   :  { %s28_s29 = sshll.u32 %s792_s28, 4  ;;  %s793_s16 = smov 64   ;;  %s29_s29 = int_to_ptr.vmem [resolvable:$true] %s28_s29 }
   0x4   :  { %s794_s17 = smov 4   ;;  %s795_s18 = smov [#allocation4]  }
   0x5   :  { %34 = dma.hbm_to_vmem [thread:$0]  %s27_s27, 512, %s29_s29, [#allocation3], %s793_s16, %s793_s16, %s794_s17  }
   0x6   :  { %s51_s19 = sshll.u32 %s795_s18, 4  ;;  %s52_s19 = int_to_ptr.vmem [resolvable:$true] %s51_s19 }
   0x7   :  { %57 = dma.hbm_to_vmem [thread:$0]  %s50_s15, 1024, %s52_s19, [#allocation5], %s793_s16, %s793_s16, %s794_s17  }
   0x8   :  { %788 = dma.done.wait [#allocation3], 512  }
   0x9   :  { %789 = vsyncadd [#allocation3], 4294966784 }
   0xa   :  { %790 = dma.done.wait [#allocation5], 1024  }
   0xb   :  { %791 = vsyncadd [#allocation5], 4294966272  ;;  %v693_v0 = vld [vmem:[#allocation2 + $0x18] sm:$0xff]  ;;  %v692_v2 = vld [vmem:[#allocation2 + $0x10] sm:$0xff]  ;;  %vm115_vm0 = vcmask 523264   ;;  %vm520_vm1 = vcmask 125952  }
   0xc   :  { %v701_v1 = vld [vmem:[%s985_s3 + $0x38] sm:$0xff]  ;;  %123 = vmatpush.bf16.msra.mxu0 %v693_v0  ;;  %v700_v3 = vld [vmem:[%s985_s3 + $0x30] sm:$0xff]  ;;  %v691_v4 = vld [vmem:[#allocation2 + $0x8] sm:$0xff] }
   0xd   :  { %202 = vmatpush.bf16.msra.mxu1 %v701_v1  ;;  %v699_v5 = vld [vmem:[%s985_s3 + $0x28] sm:$0xff]  ;;  %v690_v6 = vld [vmem:[#allocation2] sm:$0xff]  ;;  %v697_v10 = vld [vmem:[%s985_s3 + $0x18] sm:$0xff] }
   0xe   :  { %v77_v7 = vld [vmem:[%s982_s0] sm:$0xf]  ;;  %v696_v11 = vld [vmem:[%s985_s3 + $0x10] sm:$0xff]  ;;  %v695_v12 = vld [vmem:[%s985_s3 + $0x8] sm:$0xff] }
   0xf   :  { %v698_v8 = vld [vmem:[%s985_s3 + $0x20] sm:$0xff]  ;;  %v78_v9 = vpack.c.bf16 %v77_v7, %v77_v7  ;;  %v709_v14 = vld [vmem:[%s987_s5 + $0x38] sm:$0xff]  ;;  %v708_v15 = vld [vmem:[%s987_s5 + $0x30] sm:$0xff] }
  0x10   :  { %124 = vmatpush.bf16.msra.mxu0 %v692_v2  ;;  %v694_v13 = vld [vmem:[%s985_s3] sm:$0xff]  ;;  %286 = vmatpush.bf16.msra.mxu2 %v709_v14  ;;  %v707_v16 = vld [vmem:[%s987_s5 + $0x28] sm:$0xff]  ;;  %v705_v18 = vld [vmem:[%s987_s5 + $0x18] sm:$0xff] }
  0x11   :  { %203 = vmatpush.bf16.msra.mxu1 %v700_v3  ;;  %v706_v17 = vld [vmem:[%s987_s5 + $0x20] sm:$0xff]  ;;  %v704_v19 = vld [vmem:[%s987_s5 + $0x10] sm:$0xff]  ;;  %v703_v26 = vld [vmem:[%s987_s5 + $0x8] sm:$0xff] }
  0x12   :  { %v734_v20 = vld [vmem:[%s984_s2] ss:$0 sm:$0xff]  ;;  %v717_v28 = vld [vmem:[#allocation4 + $0x38] sm:$0xff]  ;;  %v716_v29 = vld [vmem:[#allocation4 + $0x30] sm:$0xff] }
  0x13   :  { %v702_v27 = vld [vmem:[%s987_s5] sm:$0xff]  ;;  %369 = vmatpush.bf16.msra.mxu3 %v717_v28  ;;  %v715_v30 = vld [vmem:[#allocation4 + $0x28] sm:$0xff]  ;;  %v713_v32 = vld [vmem:[#allocation4 + $0x18] sm:$0xff] }
  0x14   :  { %125 = vmatpush.bf16.msra.mxu0 %v691_v4  ;;  %287 = vmatpush.bf16.msra.mxu2 %v708_v15  ;;  %v714_v31 = vld [vmem:[#allocation4 + $0x20] sm:$0xff]  ;;  %v712_v33 = vld [vmem:[#allocation4 + $0x10] sm:$0xff]  ;;  %v711_v41 = vld [vmem:[#allocation4 + $0x8] sm:$0xff] }
  0x15   :  { %204 = vmatpush.bf16.msra.mxu1 %v699_v5  ;;  %v735_v34 = vld [vmem:[%s986_s4] ss:$0 sm:$0xff]  ;;  %v725_v43 = vld [vmem:[%s991_s9 + $0x38] sm:$0xff]  ;;  %v724_v44 = vld [vmem:[%s991_s9 + $0x30] sm:$0xff] }
  0x16   :  { %v710_v42 = vld [vmem:[#allocation4] sm:$0xff]  ;;  %v723_v45 = vld [vmem:[%s991_s9 + $0x28] sm:$0xff]  ;;  %v721_v47 = vld [vmem:[%s991_s9 + $0x18] sm:$0xff] }
  0x17   :  { %370 = vmatpush.bf16.msra.mxu3 %v716_v29  ;;  %v722_v46 = vld [vmem:[%s991_s9 + $0x20] sm:$0xff]  ;;  %v720_v48 = vld [vmem:[%s991_s9 + $0x10] sm:$0xff]  ;;  %v719_v55 = vld [vmem:[%s991_s9 + $0x8] sm:$0xff] }
  0x18   :  { %126 = vmatpush.bf16.msra.mxu0 %v690_v6  ;;  %288 = vmatpush.bf16.msra.mxu2 %v707_v16  ;;  %v736_v49 = vld [vmem:[%s988_s6] ss:$0 sm:$0xff]  ;;  %v729_v57 = vld [vmem:[%s993_s11 + $0x18] sm:$0xff]  ;;  %v728_v58 = vld [vmem:[%s993_s11 + $0x10] sm:$0xff] }
  0x19   :  { %205 = vmatpush.bf16.msra.mxu1 %v698_v8  ;;  %v718_v56 = vld [vmem:[%s991_s9] sm:$0xff]  ;;  %v727_v59 = vld [vmem:[%s993_s11 + $0x8] sm:$0xff] }
  0x1a   :  { %v737_v60 = vld [vmem:[%s990_s8] ss:$0 sm:$0xff] }
  0x1b   :  { %544 = vmatmul.msk.bf16.vlgmr.msra.gmra.mxu0 %vm115_vm0, %v78_v9  ;;  %371 = vmatpush.bf16.msra.mxu3 %v715_v30  ;;  %v726_v3 = vld [vmem:[%s993_s11] sm:$0xff] }
  0x1c   :  { %289 = vmatpush.bf16.msra.mxu2 %v706_v17  ;;  %453 = vmatpush.bf16.msrb.mxu0 %v725_v43  ;;  %v738_v4 = vld [vmem:[%s992_s10] ss:$0 sm:$0xff] }
  0x1d   :  { %206 = vmatpush.bf16.msra.mxu1 %v697_v10  ;;  %v739_v10 = vld [vmem:[%s994_s12] ss:$0 sm:$0xff] }
  0x1f   :  { %372 = vmatpush.bf16.msra.mxu3 %v714_v31 }
  0x20   :  { %290 = vmatpush.bf16.msra.mxu2 %v705_v18  ;;  %454 = vmatpush.bf16.msrb.mxu0 %v724_v44 }
  0x21   :  { %207 = vmatpush.bf16.msra.mxu1 %v696_v11 }
  0x23   :  { %373 = vmatpush.bf16.msra.mxu3 %v713_v32 }
  0x24   :  { %291 = vmatpush.bf16.msra.mxu2 %v704_v19  ;;  %455 = vmatpush.bf16.msrb.mxu0 %v723_v45 }
  0x25   :  { %208 = vmatpush.bf16.msra.mxu1 %v695_v12 }
  0x27   :  { %374 = vmatpush.bf16.msra.mxu3 %v712_v33 }
  0x28   :  { %292 = vmatpush.bf16.msra.mxu2 %v703_v26  ;;  %456 = vmatpush.bf16.msrb.mxu0 %v722_v46 }
  0x29   :  { %209 = vmatpush.bf16.msra.mxu1 %v694_v13 }
  0x2b   :  { %375 = vmatpush.bf16.msra.mxu3 %v711_v41 }
  0x2c   :  { %293 = vmatpush.bf16.msra.mxu2 %v702_v27  ;;  %457 = vmatpush.bf16.msrb.mxu0 %v721_v47 }
  0x2d   :  { %511 = vmatpush.bf16.msrb.mxu1 %v729_v57 }
  0x2f   :  { %376 = vmatpush.bf16.msra.mxu3 %v710_v42 }
  0x30   :  { %458 = vmatpush.bf16.msrb.mxu0 %v720_v48 }
  0x31   :  { %512 = vmatpush.bf16.msrb.mxu1 %v728_v58 }
  0x34   :  { %459 = vmatpush.bf16.msrb.mxu0 %v719_v55 }
  0x35   :  { %513 = vmatpush.bf16.msrb.mxu1 %v727_v59 }
  0x38   :  { %460 = vmatpush.bf16.msrb.mxu0 %v718_v56 }
  0x39   :  { %514 = vmatpush.bf16.msrb.mxu1 %v726_v3 }
  0x98   :  { %v128_v21 = vpop.f32.mrf.mxu0 }
  0x99   :  { %v129_v22 = vadd.f32 %v734_v20, %v128_v21 }
  0x9b   :  { %v132_v23 = vmax.f32 %v129_v22, 0.0 }
  0x9d   :  { %v133_v24 = vpack.c.bf16 %v132_v23, %v132_v23 }
  0x9f   :  { %210 = vmatmul.bf16.vlgmr.msra.gmra.mxu1 %v133_v24 }
  0xa0   :  { %v130_v25 = vpop.f32.mrf.mxu0 }
 0x11c   :  { %v211_v35 = vpop.f32.mrf.mxu1 }
 0x11d   :  { %v212_v36 = vadd.f32 %v735_v34, %v211_v35 }
 0x11f   :  { %v215_v37 = vmax.f32 %v212_v36, 0.0 }
 0x121   :  { %v216_v38 = vadd.f32 %v215_v37, %v132_v23 }
 0x123   :  { %v217_v39 = vpack.c.bf16 %v216_v38, %v216_v38 }
 0x124   :  { %v213_v40 = vpop.f32.mrf.mxu1 }
 0x125   :  { %294 = vmatmul.bf16.vlgmr.msra.gmra.mxu2 %v217_v39 }
 0x1a8   :  { %v295_v50 = vpop.f32.mrf.mxu2 }
 0x1a9   :  { %v296_v51 = vadd.f32 %v736_v49, %v295_v50 }
 0x1ab   :  { %v299_v52 = vmax.f32 %v296_v51, 0.0 }
 0x1ad   :  { %v300_v53 = vpack.c.bf16 %v299_v52, %v299_v52 }
 0x1af   :  { %377 = vmatmul.bf16.vlgmr.msra.gmra.mxu3 %v300_v53 }
 0x1b0   :  { %v297_v54 = vpop.f32.mrf.mxu2 }
 0x232   :  { %v378_v61 = vpop.f32.mrf.mxu3 }
 0x233   :  { %v379_v62 = vadd.f32 %v737_v60, %v378_v61 }
 0x235   :  { %v382_v63 = vmax.f32 %v379_v62, 0.0 }
 0x237   :  { %v383_v0 = vadd.f32 %v382_v63, %v299_v52 }
 0x239   :  { %v384_v1 = vpack.c.bf16 %v383_v0, %v383_v0 }
 0x23a   :  { %v380_v2 = vpop.f32.mrf.mxu3 }
 0x23b   :  { %461 = vmatmul.bf16.vlgmr.msrb.gmra.mxu0 %v384_v1 }
 0x2b8   :  { %v462_v5 = vpop.f32.mrf.mxu0 }
 0x2b9   :  { %v463_v6 = vadd.f32 %v738_v4, %v462_v5 }
 0x2bb   :  { %v466_v7 = vmax.f32 %v463_v6, 0.0 }
 0x2bd   :  { %v467_v8 = vpack.c.bf16 %v466_v7, %v466_v7 }
 0x2bf   :  { %689 = vmatmul.msk.bf16.vlgmr.msrb.gmra.mxu1 %vm115_vm0, %v467_v8 }
 0x2c0   :  { %v464_v9 = vpop.f32.mrf.mxu0 }
 0x33c   :  { %v516_v11 = vpop.f32.mrf.mxu1 }
 0x33d   :  { %v517_v12 = vadd.f32 %v739_v10, %v516_v11 }
 0x33f   :  { %521 = vst.msk [vmem:[%s995_s13] sm:$0xf] %vm520_vm1, %v517_v12 }
 0x344   :  { %v518_v13 = vpop.f32.mrf.mxu1 }
 0x345   :  { %526 = vsyncpa [#allocation3], 1 }
 0x346   :  { %527 = vsyncpa [#allocation5], 1 }

</bundles_post_ra>
